<compile_context>
chip_gen: v7x
topology: tpu7x:2x2x1
jax: 0.10.0
libtpu: 0.0.40
codegen_flags: <defaults>
</compile_context>

<pallas_src>
import functools

import jax
import jax.numpy as jnp
from jax.experimental import pallas as pl
from jax.experimental.pallas import tpu as pltpu

MAX_BATCH_TILE = 1024                  # big tiles amortize per-grid-step overhead (v5e/v6e)
TILE_VMEM_BUDGET = 16 * 1024 * 1024    # double-buffered batch tiles stay under this
VMEM_LIMIT_CAP = 48 * 1024 * 1024      # safe on v7x (64 MiB physical) and below


def _round_up(n, m):
    return -(-n // m) * m


def _pick_batch_tile(batch, per_row_bytes):
    """Rows per grid step.

    * block == full batch for tiny B (full-dim blocks are always legal),
    * otherwise a multiple of 16 (bf16 sublane packing) sized so the grid has ~4
      steps (>=2 steps -> both v7x TensorCores get work on the "parallel" axis)
      while double-buffered batch tiles stay inside TILE_VMEM_BUDGET.
    """
    if batch <= 16:
        return batch
    tb = _round_up(max(-(-batch // 4), 16), 16)
    tb = min(tb, MAX_BATCH_TILE)
    budget_rows = TILE_VMEM_BUDGET // max(2 * per_row_bytes, 1)
    budget_rows = max(16, (budget_rows // 16) * 16)
    return max(16, min(tb, budget_rows))


def _vmem_limit(resident_bytes, tile_bytes):
    # Everything double-buffered by default + margin; capped for v7x's 64 MiB VMEM.
    need = 2 * (resident_bytes + tile_bytes) + (2 << 20)
    return int(min(max(need, 32 << 20), VMEM_LIMIT_CAP))


# ----------------------------------------------------------------------------
# Kernels
# ----------------------------------------------------------------------------
def _full_forward_kernel(x_ref, w1_ref, b1_ref, w2_ref, b2_ref, beta_ref,
                         f_ref, rep_ref):
    """Per batch tile: rep = ReLU(x@W1 + b1)@W2 + b2 ; f = rep @ beta.

    x arrives f32 at its true width and is cast to bf16 here (no wrapper
    pad/cast pass). Matmuls run on the MXU with f32 accumulation; bias add /
    ReLU stay f32 on the VPU.
    """
    x_bf = x_ref[...].astype(jnp.bfloat16)
    h = jnp.dot(x_bf, w1_ref[...], preferred_element_type=jnp.float32) + b1_ref[...]
    h = jnp.maximum(h, 0.0)
    rep = jnp.dot(h.astype(jnp.bfloat16), w2_ref[...],
                  preferred_element_type=jnp.float32) + b2_ref[...]
    rep_ref[...] = rep
    # bf16 x bf16 on the MXU (f32 accumulation); exact for the default 0/1 beta.
    f_ref[...] = jnp.dot(rep.astype(jnp.bfloat16), beta_ref[...],
                         preferred_element_type=jnp.float32)


def _beta_only_kernel(x_ref, beta_ref, f_ref):
    """rep_learning path: f = x @ beta (rep == x is returned by the wrapper)."""
    f_ref[...] = jnp.dot(x_ref[...].astype(jnp.bfloat16), beta_ref[...],
                         preferred_element_type=jnp.float32)


# ----------------------------------------------------------------------------
# Wrapper
# ----------------------------------------------------------------------------
@functools.partial(jax.jit, static_argnames=("rep_learning",))
def base_class_forward(x, params, rep_learning=False, fast_beta=None):
    """Pallas equivalent of BaseClass.forward(x, rep_learning, fast_beta)."""
    beta = params["beta"] if fast_beta is None else fast_beta[0]
    B = x.shape[0]
    phi_odim, out_dim = beta.shape
    x = x.astype(jnp.float32)
    beta_bf = beta.astype(jnp.bfloat16)   # exact for the default 0/1 beta

    if rep_learning:
        # rep is x itself -> no kernel copy / no extra HBM round trip.
        assert x.shape[1] == phi_odim, "rep_learning requires x feature dim == phi_odim"
        per_row = (phi_odim + out_dim) * 4
        TB = _pick_batch_tile(B, per_row)
        grid = (pl.cdiv(B, TB),)
        cparams = pltpu.CompilerParams(
            dimension_semantics=("parallel",),
            vmem_limit_bytes=_vmem_limit(beta_bf.size * 2, TB * per_row))
        cost = pl.CostEstimate(
            flops=2 * B * phi_odim * out_dim,
            transcendentals=0,
            bytes_accessed=B * phi_odim * 4 + beta_bf.size * 2 + B * out_dim * 4)
        f_beta = pl.pallas_call(
            _beta_only_kernel,
            out_shape=jax.ShapeDtypeStruct((B, out_dim), jnp.float32),
            grid=grid,
            in_specs=[
                pl.BlockSpec((TB, phi_odim), lambda i: (i, 0)),     # x: batch-tiled
                pl.BlockSpec((phi_odim, out_dim), lambda i: (0, 0)),  # beta: resident
            ],
            out_specs=pl.BlockSpec((TB, out_dim), lambda i: (i, 0)),
            compiler_params=cparams,
            cost_estimate=cost,
        )(x, beta_bf)
        return f_beta, x

    w1, b1, w2, b2 = params["w1"], params["b1"], params["w2"], params["b2"]
    input_dim, hidden_dim = w1.shape
    assert w2.shape[1] == phi_odim, "beta/fast_beta rows must equal Phi output dim"

    # Weight-like operands: one-time bf16 cast (tiny, grid-invariant, VMEM-resident).
    w1_bf = w1.astype(jnp.bfloat16)
    w2_bf = w2.astype(jnp.bfloat16)
    b1_f = b1.reshape(1, hidden_dim).astype(jnp.float32)
    b2_f = b2.reshape(1, phi_odim).astype(jnp.float32)

    # per-row bytes of batch-tiled traffic + in-kernel intermediate h (VMEM budget).
    per_row = (input_dim + hidden_dim + phi_odim + out_dim) * 4
    TB = _pick_batch_tile(B, per_row)
    grid = (pl.cdiv(B, TB),)

    resident = (w1_bf.size + w2_bf.size + beta_bf.size) * 2 + (b1_f.size + b2_f.size) * 4
    cparams = pltpu.CompilerParams(
        dimension_semantics=("parallel",),
        vmem_limit_bytes=_vmem_limit(resident, TB * per_row))

    flops = 2 * B * (input_dim * hidden_dim + hidden_dim * phi_odim + phi_odim * out_dim)
    bytes_accessed = (x.size * 4 + resident + B * phi_odim * 4 + B * out_dim * 4)
    cost = pl.CostEstimate(flops=flops, transcendentals=0,
                           bytes_accessed=bytes_accessed)

    f_beta, rep = pl.pallas_call(
        _full_forward_kernel,
        out_shape=(jax.ShapeDtypeStruct((B, out_dim), jnp.float32),
                   jax.ShapeDtypeStruct((B, phi_odim), jnp.float32)),
        grid=grid,
        in_specs=[
            pl.BlockSpec((TB, input_dim), lambda i: (i, 0)),          # x: batch-tiled
            pl.BlockSpec((input_dim, hidden_dim), lambda i: (0, 0)),  # W1: resident
            pl.BlockSpec((1, hidden_dim), lambda i: (0, 0)),          # b1: resident
            pl.BlockSpec((hidden_dim, phi_odim), lambda i: (0, 0)),   # W2: resident
            pl.BlockSpec((1, phi_odim), lambda i: (0, 0)),            # b2: resident
            pl.BlockSpec((phi_odim, out_dim), lambda i: (0, 0)),      # beta: resident
        ],
        out_specs=(pl.BlockSpec((TB, out_dim), lambda i: (i, 0)),     # f: true width
                   pl.BlockSpec((TB, phi_odim), lambda i: (i, 0))),   # rep: true width
        compiler_params=cparams,
        cost_estimate=cost,
    )(x, w1_bf, b1_f, w2_bf, b2_f, beta_bf)

    return f_beta, rep


def init_params(key, input_dim, hidden_dim, phi_odim, out_dim):
    """Deterministic synthetic parameters (shapes per BaseClass.__init__).

    Weights stored as (in, out) = W.T relative to torch's (out, in).
    """
    k1, k2, k3, k4 = jax.random.split(key, 4)
    w1 = jax.random.normal(k1, (input_dim, hidden_dim), jnp.float32) * 0.1
    b1 = jax.random.normal(k2, (1, hidden_dim), jnp.float32) * 0.01
    w2 = jax.random.normal(k3, (hidden_dim, phi_odim), jnp.float32) * 0.1
    b2 = jax.random.normal(k4, (1, phi_odim), jnp.float32) * 0.01
    # beta init exactly as in BaseClass.__init__: zeros, [i, i] = 1.0 for i < out_dim
    beta = jnp.zeros((phi_odim, out_dim), jnp.float32)
    beta = beta.at[jnp.arange(out_dim), jnp.arange(out_dim)].set(1.0)
    return {"w1": w1, "b1": b1, "w2": w2, "b2": b2, "beta": beta}


# ----------------------------------------------------------------------------
# Main
# ----------------------------------------------------------------------------
if __name__ == "__main__":
    B, input_dim, hidden_dim, phi_odim, out_dim = 8, 32, 64, 32, 1

    key = jax.random.PRNGKey(0)
    kx, kp, kb = jax.random.split(key, 3)
    x = jax.random.normal(kx, (B, input_dim), jnp.float32)
    params = init_params(kp, input_dim, hidden_dim, phi_odim, out_dim)

    # Default path: rep = Phi(x), f_beta = rep @ beta
    f_beta, rep = base_class_forward(x, params)
    jax.block_until_ready((f_beta, rep))
    assert f_beta.shape == (B, out_dim) and rep.shape == (B, phi_odim)

    # bf16-at-MXU-boundary reference (matches kernel numerics).
    w1b = params["w1"].astype(jnp.bfloat16)
    w2b = params["w2"].astype(jnp.bfloat16)
    betab = params["beta"].astype(jnp.bfloat16)
    h_bf = jnp.maximum(
        jnp.dot(x.astype(jnp.bfloat16), w1b, preferred_element_type=jnp.float32)
        + params["b1"], 0.0)
    rep_bf = jnp.dot(h_bf.astype(jnp.bfloat16), w2b,
                     preferred_element_type=jnp.float32) + params["b2"]
    f_bf = jnp.dot(rep_bf.astype(jnp.bfloat16), betab,
                   preferred_element_type=jnp.float32)

    # Pure-f32 reference.
    h_f32 = jnp.maximum(x @ params["w1"] + params["b1"], 0.0)
    rep_f32 = h_f32 @ params["w2"] + params["b2"]
    f_f32 = rep_f32 @ params["beta"]

    assert jnp.allclose(rep, rep_bf, atol=1e-3, rtol=1e-3), "rep mismatch (bf16 ref)"
    assert jnp.allclose(f_beta, f_bf, atol=1e-3, rtol=1e-3), "f_beta mismatch (bf16 ref)"
    assert jnp.allclose(rep, rep_f32, atol=5e-2), "rep mismatch (f32 ref)"
    assert jnp.allclose(f_beta, f_f32, atol=5e-2), "f_beta mismatch (f32 ref)"

    # rep_learning=True path: rep = x, f_beta = x @ beta (phi_odim == input_dim here)
    f2, rep2 = base_class_forward(x, params, rep_learning=True)
    jax.block_until_ready((f2, rep2))
    assert jnp.array_equal(rep2, x), "rep_learning rep must be x"
    f2_ref = jnp.dot(x.astype(jnp.bfloat16), betab, preferred_element_type=jnp.float32)
    assert jnp.allclose(f2, f2_ref, atol=1e-3, rtol=1e-3), "rep_learning f mismatch (bf16 ref)"
    assert jnp.allclose(f2, x @ params["beta"], atol=2e-2), "rep_learning f mismatch (f32 ref)"

    # fast_beta path: f_beta = rep @ fast_beta[0]
    fb_mat = jax.random.normal(kb, (phi_odim, out_dim), jnp.float32) * 0.5
    f3, rep3 = base_class_forward(x, params, fast_beta=(fb_mat,))
    jax.block_until_ready((f3, rep3))
    f3_ref = jnp.dot(rep_bf.astype(jnp.bfloat16), fb_mat.astype(jnp.bfloat16),
                     preferred_element_type=jnp.float32)
    assert jnp.allclose(rep3, rep_bf, atol=1e-3, rtol=1e-3), "fast_beta rep mismatch"
    assert jnp.allclose(f3, f3_ref, atol=1e-3, rtol=1e-3), "fast_beta mismatch (bf16 ref)"
    assert jnp.allclose(f3, rep_f32 @ fb_mat, atol=5e-2), "fast_beta mismatch (f32 ref)"

    print("KERNEL_OK")
</pallas_src>

<mosaic_0001>
module attributes {stable_mosaic.version = 11 : i64} {
  func.func @_full_forward_kernel(%arg0: i32, %arg1: memref<8x32xf32, #tpu.memory_space<vmem>>, %arg2: memref<32x64xbf16, #tpu.memory_space<vmem>>, %arg3: memref<1x64xf32, #tpu.memory_space<vmem>>, %arg4: memref<64x32xbf16, #tpu.memory_space<vmem>>, %arg5: memref<1x32xf32, #tpu.memory_space<vmem>>, %arg6: memref<32x1xbf16, #tpu.memory_space<vmem>>, %arg7: memref<8x1xf32, #tpu.memory_space<vmem>>, %arg8: memref<8x32xf32, #tpu.memory_space<vmem>>) attributes {dimension_semantics = [#tpu.dimension_semantics<parallel>], iteration_bounds = array<i64: 1>, scalar_prefetch = 0 : i64, scratch_operands = 0 : i64, tpu.core_type = #tpu.core_type<tc>, window_params = [{transform_indices = @transform_0, window_bounds = array<i64: 8, 32>}, {pipeline_mode = #tpu.pipeline_mode<synchronous>, transform_indices = @transform_1, window_bounds = array<i64: 32, 64>}, {pipeline_mode = #tpu.pipeline_mode<synchronous>, transform_indices = @transform_2, window_bounds = array<i64: 1, 64>}, {pipeline_mode = #tpu.pipeline_mode<synchronous>, transform_indices = @transform_3, window_bounds = array<i64: 64, 32>}, {pipeline_mode = #tpu.pipeline_mode<synchronous>, transform_indices = @transform_4, window_bounds = array<i64: 1, 32>}, {pipeline_mode = #tpu.pipeline_mode<synchronous>, transform_indices = @transform_5, window_bounds = array<i64: 32, 1>}, {transform_indices = @transform_6, window_bounds = array<i64: 8, 1>}, {transform_indices = @transform_7, window_bounds = array<i64: 8, 32>}]} {
    %c0 = arith.constant 0 : index
    %c0_0 = arith.constant 0 : index
    %0 = vector.load %arg1[%c0, %c0_0] : memref<8x32xf32, #tpu.memory_space<vmem>>, vector<8x32xf32>
    %1 = arith.truncf %0 : vector<8x32xf32> to vector<8x32xbf16>
    %c0_1 = arith.constant 0 : index
    %c0_2 = arith.constant 0 : index
    %2 = vector.load %arg2[%c0_1, %c0_2] : memref<32x64xbf16, #tpu.memory_space<vmem>>, vector<32x64xbf16>
    %cst = arith.constant dense<0.000000e+00> : vector<8x64xf32>
    %3 = tpu.matmul %1, %2, %cst {dimension_numbers = #tpu.dot_dimension_numbers<[1], [0], [0], [1], [0, 0, 1, 1], [], []>} : vector<8x32xbf16>, vector<32x64xbf16>, vector<8x64xf32> -> vector<8x64xf32>
    %c0_3 = arith.constant 0 : index
    %c0_4 = arith.constant 0 : index
    %4 = vector.load %arg3[%c0_3, %c0_4] : memref<1x64xf32, #tpu.memory_space<vmem>>, vector<1x64xf32>
    %5 = vector.broadcast %4 : vector<1x64xf32> to vector<8x64xf32>
    %6 = arith.addf %3, %5 : vector<8x64xf32>
    %cst_5 = arith.constant 0.000000e+00 : f32
    %7 = vector.broadcast %cst_5 : f32 to vector<8x64xf32>
    %8 = arith.maximumf %6, %7 : vector<8x64xf32>
    %9 = arith.truncf %8 : vector<8x64xf32> to vector<8x64xbf16>
    %c0_6 = arith.constant 0 : index
    %c0_7 = arith.constant 0 : index
    %10 = vector.load %arg4[%c0_6, %c0_7] : memref<64x32xbf16, #tpu.memory_space<vmem>>, vector<64x32xbf16>
    %cst_8 = arith.constant dense<0.000000e+00> : vector<8x32xf32>
    %11 = tpu.matmul %9, %10, %cst_8 {dimension_numbers = #tpu.dot_dimension_numbers<[1], [0], [0], [1], [0, 0, 1, 1], [], []>} : vector<8x64xbf16>, vector<64x32xbf16>, vector<8x32xf32> -> vector<8x32xf32>
    %c0_9 = arith.constant 0 : index
    %c0_10 = arith.constant 0 : index
    %12 = vector.load %arg5[%c0_9, %c0_10] : memref<1x32xf32, #tpu.memory_space<vmem>>, vector<1x32xf32>
    %13 = vector.broadcast %12 : vector<1x32xf32> to vector<8x32xf32>
    %14 = arith.addf %11, %13 : vector<8x32xf32>
    %c0_11 = arith.constant 0 : index
    %c0_12 = arith.constant 0 : index
    %15 = vector.load %arg8[%c0_11, %c0_12] : memref<8x32xf32, #tpu.memory_space<vmem>>, vector<8x32xf32>
    tpu.vector_store %arg8[%c0_11, %c0_12], %14 {strides = array<i32>} : memref<8x32xf32, #tpu.memory_space<vmem>>, vector<8x32xf32>,
    %16 = arith.truncf %14 : vector<8x32xf32> to vector<8x32xbf16>
    %c0_13 = arith.constant 0 : index
    %c0_14 = arith.constant 0 : index
    %17 = vector.load %arg6[%c0_13, %c0_14] : memref<32x1xbf16, #tpu.memory_space<vmem>>, vector<32x1xbf16>
    %cst_15 = arith.constant dense<0.000000e+00> : vector<8x1xf32>
    %18 = tpu.matmul %16, %17, %cst_15 {dimension_numbers = #tpu.dot_dimension_numbers<[1], [0], [0], [1], [0, 0, 1, 1], [], []>} : vector<8x32xbf16>, vector<32x1xbf16>, vector<8x1xf32> -> vector<8x1xf32>
    %c0_16 = arith.constant 0 : index
    %c0_17 = arith.constant 0 : index
    %19 = vector.load %arg7[%c0_16, %c0_17] : memref<8x1xf32, #tpu.memory_space<vmem>>, vector<8x1xf32>
    tpu.vector_store %arg7[%c0_16, %c0_17], %18 {strides = array<i32>} : memref<8x1xf32, #tpu.memory_space<vmem>>, vector<8x1xf32>,
    return
  }
  func.func @transform_0(%arg0: i32) -> (i32, i32) {
    %c0_i32 = arith.constant 0 : i32
    %c0_i32_0 = arith.constant 0 : i32
    return %arg0, %c0_i32 : i32, i32
  }
  func.func @transform_1(%arg0: i32) -> (i32, i32) {
    %c0_i32 = arith.constant 0 : i32
    %c0_i32_0 = arith.constant 0 : i32
    %c0_i32_1 = arith.constant 0 : i32
    return %c0_i32, %c0_i32_0 : i32, i32
  }
  func.func @transform_2(%arg0: i32) -> (i32, i32) {
    %c0_i32 = arith.constant 0 : i32
    %c0_i32_0 = arith.constant 0 : i32
    %c0_i32_1 = arith.constant 0 : i32
    return %c0_i32, %c0_i32_0 : i32, i32
  }
  func.func @transform_3(%arg0: i32) -> (i32, i32) {
    %c0_i32 = arith.constant 0 : i32
    %c0_i32_0 = arith.constant 0 : i32
    %c0_i32_1 = arith.constant 0 : i32
    return %c0_i32, %c0_i32_0 : i32, i32
  }
  func.func @transform_4(%arg0: i32) -> (i32, i32) {
    %c0_i32 = arith.constant 0 : i32
    %c0_i32_0 = arith.constant 0 : i32
    %c0_i32_1 = arith.constant 0 : i32
    return %c0_i32, %c0_i32_0 : i32, i32
  }
  func.func @transform_5(%arg0: i32) -> (i32, i32) {
    %c0_i32 = arith.constant 0 : i32
    %c0_i32_0 = arith.constant 0 : i32
    %c0_i32_1 = arith.constant 0 : i32
    return %c0_i32, %c0_i32_0 : i32, i32
  }
  func.func @transform_6(%arg0: i32) -> (i32, i32) {
    %c0_i32 = arith.constant 0 : i32
    %c0_i32_0 = arith.constant 0 : i32
    return %arg0, %c0_i32 : i32, i32
  }
  func.func @transform_7(%arg0: i32) -> (i32, i32) {
    %c0_i32 = arith.constant 0 : i32
    %c0_i32_0 = arith.constant 0 : i32
    return %arg0, %c0_i32 : i32, i32
  }
}

</mosaic_0001>

<bundles_post_ra>
// kernel: base_class_forward.1
= control target key start
LH: loop header
LB: loop body
LE: loop exit
PB: predicated region body
PF: predicated region fallthrough
CT: control target
= control target key end

     0   :  { %v349_v1 = vmov 0.0   ;;  %vm350_vm0 = vmmov 0   ;;  %vm52_vm1 = vcmask 261120   ;;  %s446_s0 = inlined_call_operand.vmem [shape: f32[8,32], index: 0, kind: input, shape index: {}]   ;;  %s447_s1 = inlined_call_operand.vmem [shape: bf16[32,64], index: 1, kind: input, shape index: {}]   ;;  %s448_s2 = inlined_call_operand.vmem [shape: f32[1,64], index: 2, kind: input, shape index: {}]   ;;  %s449_s3 = inlined_call_operand.vmem [shape: bf16[64,32], index: 3, kind: input, shape index: {}]   ;;  %s450_s4 = inlined_call_operand.vmem [shape: f32[1,32], index: 4, kind: input, shape index: {}]   ;;  %s451_s5 = inlined_call_operand.vmem [shape: bf16[32,1], index: 5, kind: input, shape index: {}]   ;;  %s452_s6 = inlined_call_operand.vmem [shape: f32[8,1], index: 6, kind: output, shape index: {0}]   ;;  %s453_s7 = inlined_call_operand.hbm [shape: f32[8,32], index: 7, kind: output, shape index: {1}]  }
   0x1   :  { %v317_v0 = vld [vmem:[%s447_s1] sm:$0xff]   ;;  %286 = vmatprep.subr.bf16.mxu0 %v349_v1  ;;  %v318_v2 = vld [vmem:[%s447_s1 + $0x8] sm:$0xff]   ;;  %294 = vmatprep.subr.bf16.mxu1 %v349_v1 }
   0x2   :  { %287 = vmatpush3.bf16.msra.mxu0 %v317_v0  ;;  %290 = vmatprep.mubr.msk.bf16.mxu0 %vm350_vm0, %v349_v1  ;;  %v27_v3 = vld [vmem:[%s446_s0] sm:$0xff]  ;;  %v320_v5 = vld [vmem:[%s449_s3 + $0x8] sm:$0xff]  }
   0x3   :  { %288 = vmatprep.subr.bf16.mxu0 %v349_v1  ;;  %v319_v4 = vld [vmem:[%s449_s3] sm:$0xff]   ;;  %302 = vmatprep.mubr.msk.bf16.mxu1 %vm350_vm0, %v349_v1  ;;  %v28_v6 = vpack.c.bf16 %v27_v3, %v27_v3 }
   0x4   :  { %295 = vmatpush3.bf16.msra.mxu1 %v319_v4 }
   0x5   :  { %296 = vmatprep.subr.bf16.mxu1 %v349_v1 }
   0x6   :  { %289 = vmatpush3.bf16.msra.mxu0 %v318_v2 }
   0x7   :  { %306 = vmatprep.subr.bf16.mxu0 %v349_v1 }
   0x8   :  { %13 = vsyncpa [#allocation3], 0  ;;  %297 = vmatpush3.bf16.msra.mxu1 %v320_v5  ;;  %v321_v7 = vld [vmem:[%s449_s3 + $0x10] sm:$0xff]   ;;  %v322_v8 = vld [vmem:[%s449_s3 + $0x18] sm:$0xff]   ;;  %vm137_vm2 = vcmask 523264  }
   0x9   :  { %291 = vmatmul.mubr.msk.bf16.vlgmr.msra.gmra.mrb[0].mxu0 %vm52_vm1, %v28_v6  ;;  %298 = vmatprep.subr.bf16.mxu1 %v349_v1  ;;  %v323_v9 = vld [vmem:[%s451_s5] sm:$0xff]   ;;  %v324_v18 = vld [vmem:[%s451_s5 + $0x8] sm:$0xff]  }
   0xa   :  { %310 = vmatprep.mubr.msk.bf16.mxu0 %vm350_vm0, %v349_v1  ;;  %307 = vmatpush3.bf16.msra.mxu0 %v323_v9  ;;  %v262_v10 = vld [vmem:[%s448_s2] ss:$0 sm:$0xff]  ;;  %s351_s2 = smov [#allocation2]  }
   0xb   :  { %308 = vmatprep.subr.bf16.mxu0 %v349_v1  ;;  %v266_v19 = vld [vmem:[%s450_s4] ss:$0 sm:$0xff]  ;;  %s252_s20 = sshll.u32 %s351_s2, 4  ;;  %s253_s20 = int_to_ptr.vmem [resolvable:$true] %s252_s20 }
   0xc   :  { %299 = vmatpush3.bf16.msra.mxu1 %v321_v7  ;;  %s325_s21 = scalar_lea.vmem %s253_s20, 128  ;;  %p330_p1 = scmp.lt.s32.totalorder %s253_s20, %s253_s20 }
   0xd   :  { %300 = vmatprep.subr.bf16.mxu1 %v349_v1  ;;  %p326_p0 = scmp.ne.s32.totalorder %s253_s20, %s325_s21  ;;  %p331_p2 = scmp.lt.s32.totalorder %s325_s21, %s325_s21 }
   0xe   :  { %309 = vmatpush3.bf16.msra.mxu0 %v324_v18 }
   0xf   :  { %p332_p3 = por %p331_p2, %p330_p1 }
  0x10   :  { %301 = vmatpush3.bf16.msra.mxu1 %v322_v8 }
  0x11   :  { %p333_p4 = pnand %p332_p3, %p326_p0 }
  0xdc   :  { %v90_v11 = vpop.f32.mrb[0].mxu0 }
  0xdd   :  { %v91_v12 = vadd.f32 %v262_v10, %v90_v11  ;;  %v292_v13 = vpop.f32.mrb[1].mxu0 }
  0xde   :  { %v93_v14 = vpop.f32.mrb[2].mxu0 }
  0xdf   :  { %v96_v15 = vmax.f32 %v91_v12, 0.0  ;;  %v293_v16 = vpop.f32.mrb[3].mxu0 }
  0xe1   :  { %v97_v17 = vpack.c.bf16 %v96_v15, %v96_v15 }
  0xe3   :  { %303 = vmatmul.mubr.msk.bf16.vlgmr.msra.gmra.mrb[0].mxu1 %vm137_vm2, %v97_v17 }
 0x1b6   :  { %v175_v20 = vpop.f32.mrb[0].mxu1 }
 0x1b7   :  { %v176_v21 = vadd.f32 %v266_v19, %v175_v20  ;;  %v304_v22 = vpop.f32.mrb[1].mxu1 }
 0x1b8   :  { %v178_v23 = vpop.f32.mrb[2].mxu1 }
 0x1b9   :  { %v182_v24 = vpack.c.bf16 %v176_v21, %v176_v21  ;;  %181 = vst.msk [vmem:[#allocation2] sm:$0xff] %vm52_vm1, %v176_v21  ;;  %v305_v25 = vpop.f32.mrb[3].mxu1 }
 0x1bb   :  { %311 = vmatmul.mubr.msk.bf16.vlgmr.msra.gmra.mrb[4].mxu0 %vm52_vm1, %v182_v24 }
 0x1bc   :  { %336 = shalt.err (!%p333_p4)
}
 0x1bd   :  { %s337_s22 = scalar_lea.hbm %s453_s7, 128 }
 0x1be   :  { %p338_p5 = scmp.ne.s32.totalorder %s453_s7, %s337_s22  ;;  %p341_p6 = scmp.lt.u32.totalorder %s337_s22, %s453_s7 }
 0x1c0   :  { %p343_p7 = pnand %p341_p6, %p338_p5 }
 0x1c2   :  { %346 = shalt.err (!%p343_p7)
}
 0x1c3   :  { %255 = dma.vmem_to_hbm [thread:$0]  %s253_s20, 128, %s453_s7, [#allocation3]   ;;  %vm242_vm3 = vcmask 7168  }
 0x28e   :  { %v236_v26 = vpop.f32.mrb[4].mxu0 }
 0x28f   :  { %243 = vst.msk [vmem:[%s452_s6] sm:$0xff] %vm242_vm3, %v236_v26  ;;  %v312_v27 = vpop.f32.mrb[5].mxu0 }
 0x290   :  { %v239_v28 = vpop.f32.mrb[6].mxu0 }
 0x291   :  { %v313_v29 = vpop.f32.mrb[7].mxu0 }
 0x292   :  { %347 = dma.done.wait [#allocation3], 128  }
 0x293   :  { %348 = vsyncadd [#allocation3], 4294967168 }
 0x294   :  { %261 = vsyncpa [#allocation3], 1 }

</bundles_post_ra>
